<compile_context>
chip_gen: v5e
topology: v5e:2x2
jax: 0.10.0
libtpu: 0.0.40
codegen_flags: <defaults>
</compile_context>

<pallas_src>
import functools

import jax
import jax.numpy as jnp
from jax.experimental import pallas as pl
from jax.experimental.pallas import tpu as pltpu


def _yolo_kernel(anchors_ref, gxy_ref, pred_ref, out_ref, *, stride):
    # anchors_ref: SMEM (A, 2) float32, raw anchors in image pixels.
    # gxy_ref:     VMEM (2, G*G) float32, rows = (grid_x*stride, grid_y*stride).
    # pred_ref:    VMEM (5+C, G*G) channel-major slab for one (batch, anchor).
    # out_ref:     VMEM (5+C, G*G) float32, channel-major result.
    a_idx = pl.program_id(1)
    C5, GG = pred_ref.shape

    p = pred_ref[...].astype(jnp.float32)                    # (C5, GG) lane-dense

    row = jax.lax.broadcasted_iota(jnp.int32, (C5, GG), 0)   # per-row id
    is_wh = (row == 2) | (row == 3)

    # Shared exponential: exp(p) on the w/h rows, exp(-p) on the sigmoid rows.
    e = jnp.exp(jnp.where(is_wh, p, -p))
    val = jnp.where(is_wh, e, 1.0 / (1.0 + e))               # exp(t) | sigmoid(t)

    # Per-row scale: [stride, stride, anchor_w, anchor_h, 1, 1, ...]
    aw = anchors_ref[a_idx, 0]
    ah = anchors_ref[a_idx, 1]
    scale = jnp.where(row < 2, jnp.float32(stride),
                      jnp.where(row == 2, aw,
                                jnp.where(row == 3, ah, jnp.float32(1.0))))

    # Per-row bias: rows 0/1 get the (already * stride) grid-cell offsets.
    gxy = gxy_ref[...]                                       # (2, GG)
    bias = jnp.where(row == 0, gxy[0:1, :],
                     jnp.where(row == 1, gxy[1:2, :], jnp.float32(0.0)))

    # Single unmasked full-tile store.
    out_ref[...] = (val * scale + bias).astype(out_ref.dtype)


def yolo_layer_pallas_cm(x, anchors, num_classes, image_dim=416):
    """Production path: x NCHW (B, A*(5+C), G, G) -> channel-major
    (B, A, 5+C, G*G) float32 (lane-dense; feed this to downstream NMS)."""
    B, C_in, G, _ = x.shape
    A = anchors.shape[0]
    C5 = num_classes + 5
    assert C_in == A * C5, "channel dim must equal num_anchors*(num_classes+5)"
    GG = G * G
    stride = float(image_dim) / float(G)

    # Metadata reshape of the contiguous NCHW tensor (no transpose, no upcast).
    pred_cm = x.reshape(B, A, C5, GG)
    anchors_f32 = jnp.asarray(anchors, dtype=jnp.float32)    # stride pre-folded

    # Host-precomputed grid-cell offsets, already scaled by stride. x varies
    # along the fast (width) axis of the flattened (gy, gx) lane dimension.
    lin = jnp.arange(GG, dtype=jnp.int32)
    gx = (lin % G).astype(jnp.float32) * stride
    gy = (lin // G).astype(jnp.float32) * stride
    gxy = jnp.stack([gx, gy], axis=0)                        # (2, G*G)

    kernel = functools.partial(_yolo_kernel, stride=stride)

    n_elem = B * A * C5 * GG
    cost = pl.CostEstimate(
        flops=8 * n_elem,
        transcendentals=n_elem,                 # one shared exp per element
        bytes_accessed=n_elem * x.dtype.itemsize + n_elem * 4
                       + 2 * GG * 4 + A * 2 * 4,
    )

    return pl.pallas_call(
        kernel,
        out_shape=jax.ShapeDtypeStruct((B, A, C5, GG), jnp.float32),
        grid=(B, A),
        in_specs=[
            pl.BlockSpec((A, 2), lambda b, a: (0, 0),
                         memory_space=pltpu.MemorySpace.SMEM),
            pl.BlockSpec((2, GG), lambda b, a: (0, 0)),
            pl.BlockSpec((None, None, C5, GG), lambda b, a: (b, a, 0, 0)),
        ],
        out_specs=pl.BlockSpec((None, None, C5, GG), lambda b, a: (b, a, 0, 0)),
        compiler_params=pltpu.CompilerParams(
            dimension_semantics=("parallel", "parallel"),
            vmem_limit_bytes=32 * 1024 * 1024,
        ),
        cost_estimate=cost,
    )(anchors_f32, gxy, pred_cm)


def yolo_layer_pallas(x, anchors, num_classes, image_dim=416):
    """API-parity wrapper matching the PyTorch output (B, A*G*G, 5+C).

    The trailing transpose is an extra full HBM pass; production code should
    consume the channel-major output of `yolo_layer_pallas_cm` directly.
    """
    out_cm = yolo_layer_pallas_cm(x, anchors, num_classes, image_dim)
    B, A, C5, GG = out_cm.shape
    return out_cm.transpose(0, 1, 3, 2).reshape(B, A * GG, C5)


def yolo_layer_reference(x, anchors, num_classes, image_dim=416):
    """Pure-JAX reference mirroring the intended PyTorch forward."""
    B, C_in, G, _ = x.shape
    A = anchors.shape[0]
    C5 = num_classes + 5
    stride = float(image_dim) / float(G)
    pred = x.reshape(B, A, C5, G, G).transpose(0, 1, 3, 4, 2).astype(jnp.float32)

    obj = jax.nn.sigmoid(pred[..., 4])
    cls = jax.nn.sigmoid(pred[..., 5:])
    tx = jax.nn.sigmoid(pred[..., 0])
    ty = jax.nn.sigmoid(pred[..., 1])

    grid_x = jnp.arange(G, dtype=jnp.float32).reshape(1, 1, 1, G)
    grid_y = jnp.arange(G, dtype=jnp.float32).reshape(1, 1, G, 1)
    scaled = anchors.astype(jnp.float32) / stride
    aw = scaled[:, 0].reshape(1, A, 1, 1)
    ah = scaled[:, 1].reshape(1, A, 1, 1)

    bx = tx + grid_x
    by = ty + grid_y
    bw = jnp.exp(pred[..., 2]) * aw
    bh = jnp.exp(pred[..., 3]) * ah
    boxes = jnp.stack([bx, by, bw, bh], axis=-1) * stride    # (B, A, G, G, 4)

    return jnp.concatenate(
        [boxes.reshape(B, -1, 4),
         obj.reshape(B, -1, 1),
         cls.reshape(B, -1, num_classes)],
        axis=-1,
    )


if __name__ == "__main__":
    # Deterministic small config: 3 anchors, 3 classes -> 5+C = 8 channels/anchor.
    num_classes = 3
    anchors = jnp.asarray([[116.0, 90.0], [156.0, 198.0], [373.0, 326.0]],
                          dtype=jnp.float32)
    A = anchors.shape[0]
    B, G, image_dim = 2, 16, 416

    key = jax.random.PRNGKey(0)
    x = jax.random.normal(key, (B, A * (num_classes + 5), G, G),
                          dtype=jnp.float32)

    out = yolo_layer_pallas(x, anchors, num_classes, image_dim)
    out = jax.block_until_ready(out)

    ref = yolo_layer_reference(x, anchors, num_classes, image_dim)
    assert out.shape == (B, A * G * G, num_classes + 5), out.shape
    assert jnp.allclose(out, ref, atol=1e-4, rtol=1e-4), "mismatch vs reference"

    print("KERNEL_OK")
</pallas_src>

<mosaic_0001>
module attributes {stable_mosaic.version = 11 : i64} {
  func.func @_yolo_kernel(%arg0: i32, %arg1: i32, %arg2: memref<3x2xf32, #tpu.memory_space<smem>>, %arg3: memref<2x256xf32, #tpu.memory_space<vmem>>, %arg4: memref<1x1x8x256xf32, #tpu.memory_space<vmem>>, %arg5: memref<1x1x8x256xf32, #tpu.memory_space<vmem>>) attributes {dimension_semantics = [#tpu.dimension_semantics<parallel>, #tpu.dimension_semantics<parallel>], iteration_bounds = array<i64: 2, 3>, scalar_prefetch = 0 : i64, scratch_operands = 0 : i64, tpu.core_type = #tpu.core_type<tc>, window_params = [{transform_indices = @transform_0, window_bounds = array<i64: 3, 2>}, {pipeline_mode = #tpu.pipeline_mode<synchronous>, transform_indices = @transform_1, window_bounds = array<i64: 2, 256>}, {transform_indices = @transform_2, window_bounds = array<i64: 1, 1, 8, 256>}, {transform_indices = @transform_3, window_bounds = array<i64: 1, 1, 8, 256>}]} {
    %c0 = arith.constant 0 : index
    %c0_0 = arith.constant 0 : index
    %c0_1 = arith.constant 0 : index
    %c0_2 = arith.constant 0 : index
    %0 = vector.load %arg4[%c0, %c0_0, %c0_1, %c0_2] : memref<1x1x8x256xf32, #tpu.memory_space<vmem>>, vector<1x1x8x256xf32>
    %1 = vector.shape_cast %0 : vector<1x1x8x256xf32> to vector<8x256xf32>
    %2 = tpu.iota {dimensions = array<i32: 0>} : vector<8x256xi32>
    %c2_i32 = arith.constant 2 : i32
    %3 = vector.broadcast %c2_i32 : i32 to vector<8x256xi32>
    %4 = arith.cmpi eq, %2, %3 : vector<8x256xi32>
    %c3_i32 = arith.constant 3 : i32
    %5 = vector.broadcast %c3_i32 : i32 to vector<8x256xi32>
    %6 = arith.cmpi eq, %2, %5 : vector<8x256xi32>
    %7 = arith.ori %4, %6 : vector<8x256xi1>
    %cst = arith.constant 0.000000e+00 : f32
    %8 = vector.broadcast %cst : f32 to vector<8x256xf32>
    %9 = arith.subf %8, %1 : vector<8x256xf32>
    %10 = arith.select %7, %1, %9 : vector<8x256xi1>, vector<8x256xf32>
    %11 = math.exp %10 : vector<8x256xf32>
    %cst_3 = arith.constant 1.000000e+00 : f32
    %12 = vector.broadcast %cst_3 : f32 to vector<8x256xf32>
    %13 = arith.addf %12, %11 : vector<8x256xf32>
    %cst_4 = arith.constant 1.000000e+00 : f32
    %14 = vector.broadcast %cst_4 : f32 to vector<8x256xf32>
    %15 = arith.divf %14, %13 : vector<8x256xf32>
    %16 = arith.select %7, %11, %15 : vector<8x256xi1>, vector<8x256xf32>
    %17 = arith.index_cast %arg1 : i32 to index
    %c0_5 = arith.constant 0 : index
    %18 = memref.load %arg2[%17, %c0_5] : memref<3x2xf32, #tpu.memory_space<smem>>
    %19 = arith.index_cast %arg1 : i32 to index
    %c1 = arith.constant 1 : index
    %20 = memref.load %arg2[%19, %c1] : memref<3x2xf32, #tpu.memory_space<smem>>
    %c2_i32_6 = arith.constant 2 : i32
    %21 = vector.broadcast %c2_i32_6 : i32 to vector<8x256xi32>
    %22 = arith.cmpi slt, %2, %21 : vector<8x256xi32>
    %c2_i32_7 = arith.constant 2 : i32
    %23 = vector.broadcast %c2_i32_7 : i32 to vector<8x256xi32>
    %24 = arith.cmpi eq, %2, %23 : vector<8x256xi32>
    %c3_i32_8 = arith.constant 3 : i32
    %25 = vector.broadcast %c3_i32_8 : i32 to vector<8x256xi32>
    %26 = arith.cmpi eq, %2, %25 : vector<8x256xi32>
    %cst_9 = arith.constant 1.000000e+00 : f32
    %27 = vector.broadcast %20 : f32 to vector<8x256xf32>
    %28 = vector.broadcast %cst_9 : f32 to vector<8x256xf32>
    %29 = arith.select %26, %27, %28 : vector<8x256xi1>, vector<8x256xf32>
    %30 = vector.broadcast %18 : f32 to vector<8x256xf32>
    %31 = arith.select %24, %30, %29 : vector<8x256xi1>, vector<8x256xf32>
    %cst_10 = arith.constant 2.600000e+01 : f32
    %32 = vector.broadcast %cst_10 : f32 to vector<8x256xf32>
    %33 = arith.select %22, %32, %31 : vector<8x256xi1>, vector<8x256xf32>
    %c0_11 = arith.constant 0 : index
    %c0_12 = arith.constant 0 : index
    %34 = vector.load %arg3[%c0_11, %c0_12] : memref<2x256xf32, #tpu.memory_space<vmem>>, vector<2x256xf32>
    %c0_i32 = arith.constant 0 : i32
    %35 = vector.broadcast %c0_i32 : i32 to vector<8x256xi32>
    %36 = arith.cmpi eq, %2, %35 : vector<8x256xi32>
    %37 = vector.extract_strided_slice %34 {offsets = [0, 0], sizes = [1, 256], strides = [1, 1]} : vector<2x256xf32> to vector<1x256xf32>
    %c1_i32 = arith.constant 1 : i32
    %38 = vector.broadcast %c1_i32 : i32 to vector<8x256xi32>
    %39 = arith.cmpi eq, %2, %38 : vector<8x256xi32>
    %40 = vector.extract_strided_slice %34 {offsets = [1, 0], sizes = [1, 256], strides = [1, 1]} : vector<2x256xf32> to vector<1x256xf32>
    %cst_13 = arith.constant 0.000000e+00 : f32
    %41 = vector.shape_cast %40 : vector<1x256xf32> to vector<1x256xf32>
    %42 = vector.broadcast %41 : vector<1x256xf32> to vector<8x256xf32>
    %43 = vector.broadcast %cst_13 : f32 to vector<8x256xf32>
    %44 = arith.select %39, %42, %43 : vector<8x256xi1>, vector<8x256xf32>
    %45 = vector.shape_cast %37 : vector<1x256xf32> to vector<1x256xf32>
    %46 = vector.broadcast %45 : vector<1x256xf32> to vector<8x256xf32>
    %47 = arith.select %36, %46, %44 : vector<8x256xi1>, vector<8x256xf32>
    %48 = arith.mulf %16, %33 : vector<8x256xf32>
    %49 = arith.addf %48, %47 : vector<8x256xf32>
    %c0_14 = arith.constant 0 : index
    %c0_15 = arith.constant 0 : index
    %c0_16 = arith.constant 0 : index
    %c0_17 = arith.constant 0 : index
    %50 = vector.load %arg5[%c0_14, %c0_15, %c0_16, %c0_17] : memref<1x1x8x256xf32, #tpu.memory_space<vmem>>, vector<1x1x8x256xf32>
    %51 = vector.shape_cast %50 : vector<1x1x8x256xf32> to vector<8x256xf32>
    %52 = vector.shape_cast %49 : vector<8x256xf32> to vector<1x1x8x256xf32>
    tpu.vector_store %arg5[%c0_14, %c0_15, %c0_16, %c0_17], %52 {strides = array<i32>} : memref<1x1x8x256xf32, #tpu.memory_space<vmem>>, vector<1x1x8x256xf32>,
    return
  }
  func.func @transform_0(%arg0: i32, %arg1: i32) -> (i32, i32) {
    %c0_i32 = arith.constant 0 : i32
    %c0_i32_0 = arith.constant 0 : i32
    %c0_i32_1 = arith.constant 0 : i32
    return %c0_i32, %c0_i32_0 : i32, i32
  }
  func.func @transform_1(%arg0: i32, %arg1: i32) -> (i32, i32) {
    %c0_i32 = arith.constant 0 : i32
    %c0_i32_0 = arith.constant 0 : i32
    %c0_i32_1 = arith.constant 0 : i32
    return %c0_i32, %c0_i32_0 : i32, i32
  }
  func.func @transform_2(%arg0: i32, %arg1: i32) -> (i32, i32, i32, i32) {
    %c0_i32 = arith.constant 0 : i32
    %c0_i32_0 = arith.constant 0 : i32
    %c0_i32_1 = arith.constant 0 : i32
    return %arg0, %arg1, %c0_i32, %c0_i32_0 : i32, i32, i32, i32
  }
  func.func @transform_3(%arg0: i32, %arg1: i32) -> (i32, i32, i32, i32) {
    %c0_i32 = arith.constant 0 : i32
    %c0_i32_0 = arith.constant 0 : i32
    %c0_i32_1 = arith.constant 0 : i32
    return %arg0, %arg1, %c0_i32, %c0_i32_0 : i32, i32, i32, i32
  }
}

</mosaic_0001>

<bundles_post_ra>
// kernel: tpu_custom_call.1
= control target key start
LH: loop header
LB: loop body
LE: loop exit
PB: predicated region body
PF: predicated region fallthrough
CT: control target
= control target key end

     0   :  { %s949_s0 = inlined_call_operand.vmem [shape: f32[3,2], index: 0, kind: input, shape index: {}]   ;;  %s950_s1 = inlined_call_operand.vmem [shape: f32[2,256], index: 1, kind: input, shape index: {}]   ;;  %s951_s2 = inlined_call_operand.hbm [shape: f32[2,3,8,256], index: 2, kind: input, shape index: {}]   ;;  %s952_s3 = inlined_call_operand.hbm [shape: f32[2,3,8,256], index: 3, kind: output, shape index: {}]  }
   0x1   :  { %959 = sst [smem:[#allocation16_spill]] %s949_s0 }
   0x2   :  { %8 = vsyncpa [#allocation5], 0 }
   0x3   :  { %9 = vsyncpa [#allocation3], 0 }
   0x4   :  { %11 = vsyncpa [#allocation3 + $0x1], 0 }
   0x5   :  { %12 = vsyncpa [#allocation4], 0 }
   0x6   :  { %14 = vsyncpa [#allocation4 + $0x1], 0  ;;  %s711_s12 = smov 0   ;;  %s713_s13 = smov 0  }
   0x7   :  { %s715_s14 = smov 0   ;;  %s717_s15 = smov 0  }
   0x8   :  { %s719_s16 = smov 0   ;;  %s721_s17 = smov 0  }
   0x9   :  { %s723_s18 = smov 0   ;;  %s725_s19 = smov 0  }
   0xa LB: > { %960 = sst [smem:[#allocation11_spill]] %s660_s12  ;;  %s424_s20 = sadd.s32 4294967295, %s688_s19   ;;  %s688_s19 = sphi %s725_s19, %s20_s19   ;;  %s684_s18 = sphi %s723_s18, %s989_s18   ;;  %s680_s17 = sphi %s721_s17, %s988_s17   ;;  %s676_s16 = sphi %s719_s16, %s987_s16   ;;  %s672_s15 = sphi %s717_s15, %s986_s15   ;;  %s668_s14 = sphi %s715_s14, %s985_s14   ;;  %s664_s13 = sphi %s713_s13, %s984_s13   ;;  %s660_s12 = sphi %s711_s12, %s983_s12  }
   0xb   : > { %s425_s21 = sadd.s32 4294967294, %s688_s19   ;;  %p96_p0 = scmp.ne.s32.totalorder %s664_s13, %s660_s12 }
   0xc   : > { %p755_p1 = scmp.eq.s32.totalorder %s424_s20, 0  ;;  %p128_p2 = scmp.eq.s32.totalorder %s425_s21, 5 }
   0xd   : > { %p426_p4 = scmp.ge.s32.totalorder %s688_s19, 1  ;;  %p135_p6 = scmp.lt.s32.totalorder %s688_s19, 7 }
   0xe   : > { %p761_p3 = por %p755_p1, %p96_p0  ;;  %p766_p5 = por %p128_p2, %p96_p0 }
   0xf   : > { %s965_s0 = sld [smem:[#allocation16_spill]]  ;;  %p774_p7 = pnand %p426_p4, %p135_p6 }
  0x10   : > { %s963_s24 = scalar_select %p766_p5, 1, 0 }
  0x11   : > { %p452_p8 = pneg %p774_p7  ;;  %s29_s29 = sadd.s32 1, %s680_s17 }
  0x12   : > { %964 = sst [smem:[#allocation12_spill]] %s963_s24  ;;  %s690_s30 = smov [#allocation2]  }
  0x13   : > { %p453_p9 = pnand %p452_p8, %p755_p1  ;;  %p30_p10 = scmp.ge.s32.totalorder %s29_s29, 3 }
  0x14   : > { %s32_s4 = sadd.s32 1, %s684_s18  ;;  %p122_p11 = scmp.eq.s32.totalorder %s424_s20, 5 }
  0x15   : > { %s147_s27 = sshll.u32 %s965_s0, 4  ;;  %p90_p12 = scmp.ne.s32.totalorder %s668_s14, %s664_s13  ;;  %s148_s27 = int_to_ptr.vmem [resolvable:$true] %s147_s27 }
  0x16   : > { %455 = dma.vmem_to_smem (!%p453_p9), %s148_s27, 64, %s690_s30, [#allocation5]  }
  0x17   : > { %s991_s29 = smov (%p30_p10, %s29_s29), 0  ;;  %s993_s4 = smov (!%p30_p10, %s32_s4), %s684_s18 }
  0x18   : > { %967 = sst [smem:[#allocation13_spill]] %s991_s29  ;;  %s83_s5 = sadd.s32 1, %s668_s14 }
  0x19   : > { %p91_p13 = scmp.eq.s32.totalorder %s688_s19, 0  ;;  %p34_p0 = scmp.ge.s32.totalorder %s993_s4, 2 }
  0x1a   : > { %p791_p2 = por %p122_p11, %p90_p12  ;;  %s79_s7 = ssub.s32 %s680_s17, %s991_s29 }
  0x1b   : > { %p797_p4 = por %p91_p13, %p90_p12  ;;  %s995_s4 = smov (%p34_p0, %s993_s4), 0 }
  0x1c   : > { %s968_s6 = scalar_select %p791_p2, 1, 0 }
  0x1d   : > { %971 = sst [smem:[#allocation15_spill]] %s995_s4  ;;  %p465_p6 = scmp.lt.s32.totalorder %s688_s19, 6 }
  0x1e   : > { %969 = sst [smem:[#allocation14_spill]] %s968_s6  ;;  %s161_s9 = sand.u32 1, %s668_s14  }
  0x1f   : > { %s78_s10 = ssub.s32 %s684_s18, %s995_s4  ;;  %s430_s11 = sshll.u32 %s680_s17, 1 }
  0x20   : > { %s80_s20 = sor.u32 %s79_s7, %s78_s10  ;;  %s429_s21 = sshll.u32 %s161_s9, 4 }
  0x21   : > { %p81_p8 = scmp.eq.s32.totalorder %s80_s20, 0  ;;  %s442_s25 = smul.u32 6, %s684_s18 }
  0x22   : > { %s165_s26 = scalar_lea.vmem [#allocation6], %s429_s21  ;;  %p457_p9 = pnand %p465_p6, %p797_p4 }
  0x23   : > { %s176_s27 = sshll.u32 %s165_s26, 4  ;;  %s170_s0 = sadd.s32 %s442_s25, %s430_s11  ;;  %s177_s27 = int_to_ptr.vmem [resolvable:$true] %s176_s27 }
  0x24   : > { %s810_s30 = scalar_select %p81_p8, %s668_s14, %s83_s5  }
  0x25   : > { %s431_s29 = sshll.u32 %s170_s0, 3  ;;  %s162_s7 = scalar_lea.sflag [#allocation3], %s161_s9 }
  0x26   : > { %s172_s6 = scalar_lea.hbm %s951_s2, %s431_s29  ;;  %185 = sbr.rel (%p774_p7) target bundleno = 94 (0x5e), region = 32 }
  0x27   : > { %s174_s4 = sshll.u32 %s172_s6, 4  ;;  %s175_s4 = int_to_ptr.hbm [resolvable:$true] %s174_s4 }
  0x28   : > { %459 = dma.hbm_to_vmem [thread:$0]  (!%p457_p9), %s175_s4, 256, %s177_s27, %s162_s7  }
  0x2b   : > { %647 = dma.done.wait (%p755_p1), [#allocation5], 64  }
  0x2c   : > { %649 = vsyncadd (%p755_p1), [#allocation5], 4294967232  ;;  %s826_s0 = sand.u32 1, %s664_s13  }
  0x2d   : > { %s434_s12 = sshll.u32 %s826_s0, 4  ;;  %s193_s24 = scalar_lea.sflag [#allocation3], %s826_s0 }
  0x2e   : > { %s196_s29 = scalar_lea.vmem [#allocation6], %s434_s12 }
  0x2f   : > { %651 = dma.done.wait (%p761_p3), %s193_s24, 256  }
  0x30   : > { %653 = vsyncadd (%p761_p3), %s193_s24, 4294967040 }
  0x31   : > { %202 = sfence }
  0x32   : > { %v221_v0 = vld [vmem:[%s196_s29] sm:$0xff]  ;;  %v222_v1 = vld [vmem:[%s196_s29 + $0x8] sm:$0xff]  ;;  %v223_v2 = vlaneseq  ;;  %s436_s22 = sshll.u32 %s672_s15, 7  ;;  %s443_s8 = smul.u32 6, %s676_s16 }
  0x33   : > { %v228_v4 = vsub.f32 0.0, %v221_v0  ;;  %v229_v5 = vsub.f32 0.0, %v222_v1  ;;  %s272_s23 = sadd.s32 1, %s436_s22  ;;  %s859_s4 = sld [smem:[#allocation2 + %s436_s22]]  ;;  %v280_v15 = vld [vmem:[%s950_s1] sm:$0xf] }
  0x34   : > { %v836_v3 = vshrl.u32 %v223_v2, 7  ;;  %s273_s28 = sld [smem:[#allocation2 + %s272_s23]]  ;;  %v284_v16 = vperm.slane %v280_v15, 1  ;;  %v292_v19 = vperm.slane %v280_v15, 0  ;;  %v285_v20 = vperm.slane %v280_v15, 3  ;;  %s438_s9 = sshll.u32 %s672_s15, 1 }
  0x35   : > { %v293_v25 = vperm.slane %v280_v15, 2  ;;  %s318_s16 = sadd.s32 %s443_s8, %s438_s9  ;;  %s220_s21 = scalar_lea.vmem [#allocation7], %s434_s12 }
  0x36   : > { %vm225_vm0 = vcmp.eq.s32.totalorder %v836_v3, 2  ;;  %vm226_vm1 = vcmp.eq.s32.totalorder %v836_v3, 3  ;;  %v288_v24 = vperm.slane %v284_v16, 1  ;;  %vm274_vm7 = vcmp.lt.s32.totalorder %v836_v3, 2  ;;  %s439_s15 = sshll.u32 %s318_s16, 3  ;;  %s322_s25 = sshll.u32 %s220_s21, 4  ;;  %s323_s25 = int_to_ptr.vmem [resolvable:$true] %s322_s25 }
  0x37   : > { %vm844_vm2 = vmor %vm225_vm0, %vm226_vm1  ;;  %vm282_vm8 = vcmp.eq.s32.totalorder %v836_v3, 1  ;;  %v289_v35 = vperm.slane %v285_v20, 1  ;;  %vm281_vm10 = vcmp.eq.s32.totalorder %v836_v3, 0  ;;  %v296_v41 = vperm.slane %v292_v19, 0  ;;  %s320_s20 = scalar_lea.hbm %s952_s3, %s439_s15  ;;  %s307_s7 = scalar_lea.sflag [#allocation4], %s826_s0 }
  0x38   : > { %v230_v7 = vsel %vm844_vm2, %v221_v0, %v228_v4  ;;  %v231_v8 = vsel %vm844_vm2, %v222_v1, %v229_v5  ;;  %v290_v44 = vsel %vm282_vm8, %v288_v24, 0.0  ;;  %v297_v46 = vperm.slane %v293_v25, 0  ;;  %s324_s27 = sshll.u32 %s320_s20, 4  ;;  %s606_s23 = scalar_lea.hbm %s952_s3, 96  ;;  %s325_s27 = int_to_ptr.hbm [resolvable:$true] %s324_s27 }
  0x39   : > { %v232_v9 = vmul.f32 1.442695, %v230_v7  ;;  %v234_v10 = vmul.f32 1.442695, %v231_v8  ;;  %v277_v23 = vstv %s859_s4  ;;  %v291_v49 = vsel %vm282_vm8, %v289_v35, 0.0  ;;  %s600_s12 = sshra.s32 %s325_s27, 4  ;;  %s601_s12 = int_to_ptr.hbm [resolvable:$true] %s600_s12 }
  0x3a   : > { %v275_v17 = vstv %s273_s28  ;;  %v298_v53 = vsel %vm281_vm10, %v296_v41, %v290_v44  ;;  %v299_v57 = vsel %vm281_vm10, %v297_v46, %v291_v49  ;;  %s602_s24 = scalar_lea.hbm %s601_s12, 16  ;;  %p607_p10 = scmp.lt.s32.totalorder %s601_s12, %s952_s3 }
  0x3b   : > { %533 = vpow2.f32 %v232_v9  ;;  %v276_v27 = vsel %vm226_vm1, %v275_v17, 1.0  ;;  %p603_p1 = scmp.ne.s32.totalorder %s601_s12, %s602_s24  ;;  %p608_p11 = scmp.lt.s32.totalorder %s606_s23, %s602_s24 }
  0x3c   : > { %535 = vpow2.f32 %v234_v10  ;;  %v278_v38 = vsel %vm225_vm0, %v277_v23, %v276_v27 }
  0x3d   : > { %v279_v48 = vsel %vm274_vm7, 26.0, %v278_v38  ;;  %p604_p3 = pnand %p603_p1, %p791_p2  ;;  %p609_p12 = por %p608_p11, %p607_p10 }
  0x3f   : > { %p605_p7 = pneg %p604_p3 }
  0x41   : > { %v853_v11 = vpop.eup %533  ;;  %p610_p13 = pnand %p609_p12, %p605_p7 }
  0x42   : > { %v855_v12 = vpop.eup %535  ;;  %v236_v13 = vadd.f32 1.0, %v853_v11 }
  0x43   : > { %v237_v14 = vadd.f32 1.0, %v855_v12 }
  0x44   : > { %537 = vrcp.f32 %v236_v13  ;;  %vm243_vm3 = vweird.f32 %v236_v13  ;;  %v249_v26 = vand.u32 2147483648, %v236_v13  ;;  %v247_v30 = vand.u32 2147483647, %v236_v13 }
  0x45   : > { %539 = vrcp.f32 %v237_v14  ;;  %v264_v31 = vand.u32 2147483648, %v237_v14  ;;  %vm258_vm5 = vweird.f32 %v237_v14  ;;  %v262_v33 = vand.u32 2147483647, %v237_v14 }
  0x46   : > { %v250_v37 = vor.u32 1.1754944e-38, %v249_v26  ;;  %vm248_vm11 = vcmp.eq.f32.partialorder %v247_v30, 8.507059e+37 }
  0x47   : > { %v265_v43 = vor.u32 1.1754944e-38, %v264_v31  ;;  %vm263_vm13 = vcmp.eq.f32.partialorder %v262_v33, 8.507059e+37 }
  0x4a   : > { %v538_v18 = vpop.eup %537 }
  0x4b   : > { %v540_v21 = vpop.eup %539  ;;  %v239_v22 = vmul.f32 %v538_v18, %v236_v13  ;;  %vm244_vm4 = vweird.f32 %v538_v18 }
  0x4c   : > { %v254_v28 = vmul.f32 %v540_v21, %v237_v14  ;;  %vm259_vm6 = vweird.f32 %v540_v21  ;;  %vm872_vm9 = vmor %vm243_vm3, %vm244_vm4 }
  0x4d   : > { %v240_v29 = vsub.f32 1.0, %v239_v22  ;;  %vm881_vm12 = vmor %vm258_vm5, %vm259_vm6 }
  0x4e   : > { %v255_v32 = vsub.f32 1.0, %v254_v28 }
  0x4f   : > { %v241_v34 = vmul.f32 %v538_v18, %v240_v29 }
  0x50   : > { %v256_v39 = vmul.f32 %v540_v21, %v255_v32 }
  0x51   : > { %v242_v40 = vadd.f32 %v538_v18, %v241_v34 }
  0x52   : > { %v257_v45 = vadd.f32 %v540_v21, %v256_v39 }
  0x53   : > { %v246_v47 = vsel %vm872_vm9, %v538_v18, %v242_v40 }
  0x54   : > { %v251_v50 = vsel %vm248_vm11, %v250_v37, %v246_v47  ;;  %v261_v51 = vsel %vm881_vm12, %v540_v21, %v257_v45 }
  0x55   : > { %v268_v52 = vsel %vm844_vm2, %v853_v11, %v251_v50  ;;  %v266_v54 = vsel %vm263_vm13, %v265_v43, %v261_v51 }
  0x56   : > { %v300_v55 = vmul.f32 %v279_v48, %v268_v52  ;;  %v269_v56 = vsel %vm844_vm2, %v855_v12, %v266_v54 }
  0x57   : > { %v301_v58 = vmul.f32 %v279_v48, %v269_v56 }
  0x58   : > { %v302_v59 = vadd.f32 %v300_v55, %v298_v53 }
  0x59   : > { %v303_v60 = vadd.f32 %v301_v58, %v299_v57 }
  0x5a   : > { %304 = vst [vmem:[%s220_s21] sm:$0xff] %v302_v59 }
  0x5b   : > { %305 = vst [vmem:[%s220_s21 + $0x8] sm:$0xff] %v303_v60 }
  0x5c   : > { %613 = shalt.err (!%p610_p13)
}
  0x5d   : > { %450 = dma.vmem_to_hbm [thread:$0]  (%p791_p2), %s323_s25, 256, %s325_s27, %s307_s7  }
  0x5e PF: > { %s979_s0 = sld [smem:[#allocation11_spill]]  ;;  %p467_p0 = scmp.ge.s32.totalorder %s688_s19, 2 }
  0x60   : > { %p461_p4 = pnand %p467_p0, %p766_p5 }
  0x62   : > { %p462_p6 = pneg %p461_p4 }
  0x64   : > { %s336_s6 = sand.u32 1, %s979_s0  }
  0x65   : > { %s337_s8 = scalar_lea.sflag [#allocation4], %s336_s6 }
  0x66   : > { %655 = dma.done.wait (%p462_p6), %s337_s8, 256  }
  0x67   : > { %657 = vsyncadd (%p462_p6), %s337_s8, 4294967040  ;;  %s20_s19 = sadd.s32 1, %s688_s19   ;;  %s981_s9 = sld [smem:[#allocation13_spill]] }
  0x68   : > { %p17_p8 = scmp.ge.s32.totalorder %s20_s19, 8   ;;  %s982_s10 = sld [smem:[#allocation15_spill]] }
  0x69   : > { %s983_s12 = smov %s664_s13  ;;  %s984_s13 = smov %s668_s14 }
  0x6a   : > { %s985_s14 = smov %s810_s30  ;;  %s986_s15 = smov %s680_s17 }
  0x6b   : > { %s987_s16 = smov %s684_s18  ;;  %19 = sbr.rel (!%p17_p8) target bundleno = 10 (0xa), region = 82 }
  0x6d   : > { %s988_s17 = smov %s981_s9 }
  0x6e   : > { %s989_s18 = smov %s982_s10 }
  0x70   :  { %343 = vsyncpa [#allocation3], 1 }
  0x71   :  { %345 = vsyncpa [#allocation3 + $0x1], 1 }
  0x72   :  { %346 = vsyncpa [#allocation4], 1 }
  0x73   :  { %348 = vsyncpa [#allocation4 + $0x1], 1 }
  0x74   :  { %349 = vsyncpa [#allocation5], 1 }
  0x75   :  { %351 = vsyncpa [#allocation5 + $0x1], 1 }

</bundles_post_ra>
